<compile_context>
chip_gen: v7x
topology: tpu7x:2x2x1
jax: 0.10.0
libtpu: 0.0.40
codegen_flags: <defaults>
</compile_context>

<pallas_src>
import functools
import math

import jax
import jax.numpy as jnp
from jax.experimental import pallas as pl
from jax.experimental.pallas import tpu as pltpu


# ---------------------------------------------------------------------------
# Parameter setup (deterministic, mirrors AxialRoPE.__init__)
# ---------------------------------------------------------------------------
def make_axial_rope_tables(head_dim: int, min_freq: float, max_freq: float,
                           n_zero_freqs: int, nh: int, nw: int):
    assert head_dim % 4 == 0
    xlim, ylim = math.sqrt(nw / nh), math.sqrt(nh / nw)
    x_HW = jnp.broadcast_to(jnp.linspace(-xlim, xlim, nw).reshape(1, nw), (nh, nw))
    y_HW = jnp.broadcast_to(jnp.linspace(-ylim, ylim, nh).reshape(nh, 1), (nh, nw))
    n_freqs = head_dim // 4
    assert 0 <= n_zero_freqs <= n_freqs
    omega = jnp.concatenate(
        (jnp.zeros((n_zero_freqs,), jnp.float32),
         min_freq * (max_freq / min_freq)
         ** jnp.linspace(0.0, 1.0, n_freqs - n_zero_freqs)))
    theta_HWF = jnp.concatenate(
        (y_HW[..., None] * omega, x_HW[..., None] * omega), axis=-1)  # (H, W, F)
    cos_HWF = jnp.cos(theta_HWF).astype(jnp.float32)
    sin_HWF = jnp.sin(theta_HWF).astype(jnp.float32)
    return cos_HWF, sin_HWF


# ---------------------------------------------------------------------------
# Wrapper-side table expansion.
#
# Per head (head_dim lanes):  COS = [cos, cos],  SIN = [-sin, +sin]  (signed).
# out[j] = x[j]*COS[j] + SIN[j] * (x[j+F] if lane-in-head < F else x[j-F])
# The selected partner lane never crosses a head / spatial-row / fold boundary,
# so roll wrap-around never contributes.
# ---------------------------------------------------------------------------
def _expand_tables(cos_HWF, sin_HWF, nheads, fold_k):
    H, W, F = cos_HWF.shape
    P = H * W
    cos_PF = cos_HWF.reshape(P, F).astype(jnp.float32)
    sin_PF = sin_HWF.reshape(P, F).astype(jnp.float32)
    cos_Pd = jnp.concatenate((cos_PF, cos_PF), axis=-1)    # (P, head_dim)
    sin_Pd = jnp.concatenate((-sin_PF, sin_PF), axis=-1)   # signed sin
    cos_PC = jnp.tile(cos_Pd, (1, nheads))                 # (P, C)
    sin_PC = jnp.tile(sin_Pd, (1, nheads))
    C = nheads * 2 * F
    R, L = P // fold_k, fold_k * C
    # TODO(synk): optional bf16 tables/compute on v6e/v7x to halve table bytes.
    return cos_PC.reshape(R, L), sin_PC.reshape(R, L)


# ---------------------------------------------------------------------------
# Pallas kernel: rotate-half rotation on lane-dense (TB, TR, L) tiles.
# Tables are (TR, L) and reused across the TB batch rows (static unroll).
# ---------------------------------------------------------------------------
def _axial_rope_kernel(cos_ref, sin_ref, x_ref, o_ref, *,
                       head_dim, half, lane_width, tb):
    cos = cos_ref[...]                                    # (TR, L) f32
    sin = sin_ref[...]                                    # (TR, L) f32, signed
    lane = jax.lax.broadcasted_iota(jnp.int32, cos.shape, 1)
    first_half = (lane % head_dim) < half                 # lane-in-head < F
    for b in range(tb):                                   # tb is small & static
        xv = x_ref[b].astype(jnp.float32)                 # (TR, L)
        # np.roll convention: roll(x, s)[j] = x[(j - s) mod width]
        fwd = pltpu.roll(xv, lane_width - half, 1)        # lane j <- x[j + half]
        bwd = pltpu.roll(xv, half, 1)                     # lane j <- x[j - half]
        rotated = jnp.where(first_half, fwd, bwd)
        o_ref[b] = (xv * cos + rotated * sin).astype(o_ref.dtype)


# ---------------------------------------------------------------------------
# Tiling heuristics
# ---------------------------------------------------------------------------
def _choose_fold(P, C, min_lanes=512):
    """Smallest k | P with (k*C) % 128 == 0, grown until k*C >= min_lanes."""
    base = None
    for k in range(1, P + 1):
        if P % k == 0 and (k * C) % 128 == 0:
            base = k
            break
    if base is None:
        return 1                      # no legal fold; full-dim block still valid
    k = base
    while k * C < min_lanes and k < P:
        rem = P // k
        grew = False
        for m in range(2, rem + 1):
            if rem % m == 0:
                k *= m
                grew = True
                break
        if not grew:
            break
    return k


def _choose_blocks(N, R, L, itemsize, target_bytes):
    """Pick (TB, TR): batch rows and folded spatial rows per tile."""
    row_bytes = L * itemsize
    slab = R * row_bytes                          # one batch element
    if slab >= target_bytes:
        TB = 1
        TR = None
        d = 8
        while d <= R:                             # largest mult-of-8 divisor fitting
            if R % d == 0 and d * row_bytes <= target_bytes:
                TR = d
            d += 8
        if TR is None:
            d = 8
            while d <= R:                         # smallest legal mult-of-8 divisor
                if R % d == 0:
                    TR = d
                    break
                d += 8
        if TR is None:
            TR = R                                # full extent (always legal)
    else:
        TR = R
        TB = 1
        for d in range(min(N, 8), 0, -1):         # cap static unroll at 8
            if N % d == 0 and d * slab <= target_bytes:
                TB = d
                break
    # Give a second TensorCore (v7x) work when the whole problem would be a
    # single grid step but is non-trivially sized.
    if (N // TB) * (R // TR) == 1 and N * slab >= (512 << 10):
        if TB % 2 == 0:
            TB //= 2
        elif TR % 16 == 0:
            TR //= 2
    return TB, TR


# ---------------------------------------------------------------------------
# Forward wrapper
# ---------------------------------------------------------------------------
def axial_rope_forward(input_NHWhd, cos_HWF, sin_HWF):
    N, H, W, nheads, head_dim = input_NHWhd.shape
    assert head_dim % 2 == 0
    F = head_dim // 2
    assert cos_HWF.shape == (H, W, F)
    P = H * W
    C = nheads * head_dim

    # Fold k spatial rows into the lane axis (pure reshape) for lane density.
    k = _choose_fold(P, C)
    R, L = P // k, k * C
    x_NRL = input_NHWhd.reshape(N, R, L)
    cos_RL, sin_RL = _expand_tables(cos_HWF, sin_HWF, nheads, k)

    itemsize = input_NHWhd.dtype.itemsize
    try:
        vmem_cap = int(pltpu.get_tpu_info().vmem_capacity_bytes)
    except Exception:
        vmem_cap = 64 << 20                       # conservative (v7x per-TC)
    # ~2.7 MiB x-tiles on v7x, 4 MiB on v5e/v6e (mem-bound roofline plateau).
    target_bytes = max(1 << 20, min(4 << 20, vmem_cap // 24))

    TB, TR = _choose_blocks(N, R, L, itemsize, target_bytes)
    n_rblk = R // TR
    n_bblk = N // TB

    # Per-step residency: double-buffered x + out tiles and 2 f32 table tiles.
    x_tile_bytes = TB * TR * L * itemsize
    tbl_tile_bytes = TR * L * 4
    resident = 2 * 2 * x_tile_bytes + 2 * 2 * tbl_tile_bytes
    vmem_limit = int(min((vmem_cap * 3) // 4,
                         max(resident + (8 << 20), 32 << 20)))

    kernel = functools.partial(_axial_rope_kernel, head_dim=head_dim, half=F,
                               lane_width=L, tb=TB)

    flops = 4 * int(x_NRL.size)                   # 2 mul + 1 add + select
    bytes_accessed = (2 * int(x_NRL.size) * itemsize      # x read + out write
                      + 2 * int(cos_RL.size) * 4)         # tables read once
    # NOTE: table pipeline depth (pl.Buffered) left at default; sweep if an
    # xprof trace shows exposed table DMA or VMEM pressure.

    out = pl.pallas_call(
        kernel,
        out_shape=jax.ShapeDtypeStruct((N, R, L), input_NHWhd.dtype),
        grid=(n_rblk, n_bblk),                    # batch innermost -> table reuse
        in_specs=[
            pl.BlockSpec((TR, L), lambda ri, bi: (ri, 0)),           # cos
            pl.BlockSpec((TR, L), lambda ri, bi: (ri, 0)),           # signed sin
            pl.BlockSpec((TB, TR, L), lambda ri, bi: (bi, ri, 0)),   # x tile
        ],
        out_specs=pl.BlockSpec((TB, TR, L), lambda ri, bi: (bi, ri, 0)),
        compiler_params=pltpu.CompilerParams(
            dimension_semantics=("parallel", "parallel"),
            vmem_limit_bytes=vmem_limit),
        cost_estimate=pl.CostEstimate(flops=flops, transcendentals=0,
                                      bytes_accessed=bytes_accessed),
    )(cos_RL, sin_RL, x_NRL)

    return out.reshape(N, H, W, nheads, head_dim)


# ---------------------------------------------------------------------------
# Pure-JAX reference (mirrors the PyTorch forward) for validation
# ---------------------------------------------------------------------------
def axial_rope_reference(input_NHWhd, cos_HWF, sin_HWF):
    F = input_NHWhd.shape[-1] // 2
    xv = input_NHWhd.astype(jnp.float32)
    x_half, y_half = xv[..., :F], xv[..., F:]
    c = cos_HWF[:, :, None, :]  # (H, W, 1, F)
    s = sin_HWF[:, :, None, :]
    x_out = x_half * c - y_half * s
    y_out = x_half * s + y_half * c
    return jnp.concatenate((x_out, y_out), axis=-1).astype(input_NHWhd.dtype)


if __name__ == "__main__":
    # Config: head_dim=32, min_freq=1.0, max_freq=10.0, n_zero_freqs=2
    head_dim = 32
    min_freq, max_freq, n_zero = 1.0, 10.0, 2
    N, H, W, nheads = 2, 8, 8, 2

    cos_HWF, sin_HWF = make_axial_rope_tables(head_dim, min_freq, max_freq,
                                              n_zero, H, W)

    key = jax.random.PRNGKey(0)
    x = jax.random.normal(key, (N, H, W, nheads, head_dim), dtype=jnp.float32)

    out = jax.block_until_ready(axial_rope_forward(x, cos_HWF, sin_HWF))
    ref = axial_rope_reference(x, cos_HWF, sin_HWF)

    assert out.shape == x.shape and out.dtype == x.dtype
    assert jnp.allclose(out, ref, atol=1e-5, rtol=1e-5), "mismatch vs reference"

    print("KERNEL_OK")
</pallas_src>

<mosaic_0001>
module attributes {stable_mosaic.version = 11 : i64} {
  func.func @_axial_rope_kernel(%arg0: i32, %arg1: i32, %arg2: memref<8x512xf32, #tpu.memory_space<vmem>>, %arg3: memref<8x512xf32, #tpu.memory_space<vmem>>, %arg4: memref<2x8x512xf32, #tpu.memory_space<vmem>>, %arg5: memref<2x8x512xf32, #tpu.memory_space<vmem>>) attributes {dimension_semantics = [#tpu.dimension_semantics<parallel>, #tpu.dimension_semantics<parallel>], iteration_bounds = array<i64: 1, 1>, scalar_prefetch = 0 : i64, scratch_operands = 0 : i64, tpu.core_type = #tpu.core_type<tc>, window_params = [{transform_indices = @transform_0, window_bounds = array<i64: 8, 512>}, {transform_indices = @transform_1, window_bounds = array<i64: 8, 512>}, {transform_indices = @transform_2, window_bounds = array<i64: 2, 8, 512>}, {transform_indices = @transform_3, window_bounds = array<i64: 2, 8, 512>}]} {
    %c0 = arith.constant 0 : index
    %c0_0 = arith.constant 0 : index
    %0 = vector.load %arg2[%c0, %c0_0] : memref<8x512xf32, #tpu.memory_space<vmem>>, vector<8x512xf32>
    %c0_1 = arith.constant 0 : index
    %c0_2 = arith.constant 0 : index
    %1 = vector.load %arg3[%c0_1, %c0_2] : memref<8x512xf32, #tpu.memory_space<vmem>>, vector<8x512xf32>
    %2 = tpu.iota {dimensions = array<i32: 1>} : vector<8x512xi32>
    %c32_i32 = arith.constant 32 : i32
    %c0_i32 = arith.constant 0 : i32
    %3 = arith.cmpi eq, %c32_i32, %c0_i32 : i32
    %c1_i32 = arith.constant 1 : i32
    %4 = arith.select %3, %c1_i32, %c32_i32 : i32
    %5 = vector.broadcast %4 : i32 to vector<8x512xi32>
    %6 = arith.remsi %2, %5 : vector<8x512xi32>
    %c0_i32_3 = arith.constant 0 : i32
    %7 = vector.broadcast %c0_i32_3 : i32 to vector<8x512xi32>
    %8 = arith.cmpi ne, %6, %7 : vector<8x512xi32>
    %c0_i32_4 = arith.constant 0 : i32
    %9 = vector.broadcast %c0_i32_4 : i32 to vector<8x512xi32>
    %10 = arith.cmpi slt, %6, %9 : vector<8x512xi32>
    %c0_i32_5 = arith.constant 0 : i32
    %11 = arith.cmpi slt, %4, %c0_i32_5 : i32
    %12 = vector.broadcast %11 : i1 to vector<8x512xi1>
    %13 = vector.broadcast %12 : vector<8x512xi1> to vector<8x512xi1>
    %14 = arith.xori %10, %13 : vector<8x512xi1>
    %15 = arith.andi %14, %8 : vector<8x512xi1>
    %16 = vector.broadcast %4 : i32 to vector<8x512xi32>
    %17 = arith.addi %6, %16 : vector<8x512xi32>
    %18 = arith.select %15, %17, %6 : vector<8x512xi1>, vector<8x512xi32>
    %c16_i32 = arith.constant 16 : i32
    %19 = vector.broadcast %c16_i32 : i32 to vector<8x512xi32>
    %20 = arith.cmpi slt, %18, %19 : vector<8x512xi32>
    %c0_6 = arith.constant 0 : index
    %c0_7 = arith.constant 0 : index
    %c0_8 = arith.constant 0 : index
    %21 = vector.load %arg4[%c0_6, %c0_7, %c0_8] : memref<2x8x512xf32, #tpu.memory_space<vmem>>, vector<1x8x512xf32>
    %22 = vector.shape_cast %21 : vector<1x8x512xf32> to vector<8x512xf32>
    %c496_i32 = arith.constant 496 : i32
    %23 = tpu.dynamic_rotate %22 by %c496_i32 dim 1 : vector<8x512xf32>, i32 -> vector<8x512xf32>
    %c16_i32_9 = arith.constant 16 : i32
    %24 = tpu.dynamic_rotate %22 by %c16_i32_9 dim 1 : vector<8x512xf32>, i32 -> vector<8x512xf32>
    %25 = arith.select %20, %23, %24 : vector<8x512xi1>, vector<8x512xf32>
    %26 = arith.mulf %22, %0 : vector<8x512xf32>
    %27 = arith.mulf %25, %1 : vector<8x512xf32>
    %28 = arith.addf %26, %27 : vector<8x512xf32>
    %c0_10 = arith.constant 0 : index
    %c0_11 = arith.constant 0 : index
    %c0_12 = arith.constant 0 : index
    %29 = vector.load %arg5[%c0_10, %c0_11, %c0_12] : memref<2x8x512xf32, #tpu.memory_space<vmem>>, vector<1x8x512xf32>
    %30 = vector.shape_cast %29 : vector<1x8x512xf32> to vector<8x512xf32>
    %31 = vector.shape_cast %28 : vector<8x512xf32> to vector<1x8x512xf32>
    tpu.vector_store %arg5[%c0_10, %c0_11, %c0_12], %31 {strides = array<i32>} : memref<2x8x512xf32, #tpu.memory_space<vmem>>, vector<1x8x512xf32>,
    %c1 = arith.constant 1 : index
    %c0_13 = arith.constant 0 : index
    %c0_14 = arith.constant 0 : index
    %32 = vector.load %arg4[%c1, %c0_13, %c0_14] : memref<2x8x512xf32, #tpu.memory_space<vmem>>, vector<1x8x512xf32>
    %33 = vector.shape_cast %32 : vector<1x8x512xf32> to vector<8x512xf32>
    %c496_i32_15 = arith.constant 496 : i32
    %34 = tpu.dynamic_rotate %33 by %c496_i32_15 dim 1 : vector<8x512xf32>, i32 -> vector<8x512xf32>
    %c16_i32_16 = arith.constant 16 : i32
    %35 = tpu.dynamic_rotate %33 by %c16_i32_16 dim 1 : vector<8x512xf32>, i32 -> vector<8x512xf32>
    %36 = arith.select %20, %34, %35 : vector<8x512xi1>, vector<8x512xf32>
    %37 = arith.mulf %33, %0 : vector<8x512xf32>
    %38 = arith.mulf %36, %1 : vector<8x512xf32>
    %39 = arith.addf %37, %38 : vector<8x512xf32>
    %c1_17 = arith.constant 1 : index
    %c0_18 = arith.constant 0 : index
    %c0_19 = arith.constant 0 : index
    %40 = vector.load %arg5[%c1_17, %c0_18, %c0_19] : memref<2x8x512xf32, #tpu.memory_space<vmem>>, vector<1x8x512xf32>
    %41 = vector.shape_cast %40 : vector<1x8x512xf32> to vector<8x512xf32>
    %42 = vector.shape_cast %39 : vector<8x512xf32> to vector<1x8x512xf32>
    tpu.vector_store %arg5[%c1_17, %c0_18, %c0_19], %42 {strides = array<i32>} : memref<2x8x512xf32, #tpu.memory_space<vmem>>, vector<1x8x512xf32>,
    return
  }
  func.func @transform_0(%arg0: i32, %arg1: i32) -> (i32, i32) {
    %c0_i32 = arith.constant 0 : i32
    %c0_i32_0 = arith.constant 0 : i32
    return %arg0, %c0_i32 : i32, i32
  }
  func.func @transform_1(%arg0: i32, %arg1: i32) -> (i32, i32) {
    %c0_i32 = arith.constant 0 : i32
    %c0_i32_0 = arith.constant 0 : i32
    return %arg0, %c0_i32 : i32, i32
  }
  func.func @transform_2(%arg0: i32, %arg1: i32) -> (i32, i32, i32) {
    %c0_i32 = arith.constant 0 : i32
    %c0_i32_0 = arith.constant 0 : i32
    return %arg1, %arg0, %c0_i32 : i32, i32, i32
  }
  func.func @transform_3(%arg0: i32, %arg1: i32) -> (i32, i32, i32) {
    %c0_i32 = arith.constant 0 : i32
    %c0_i32_0 = arith.constant 0 : i32
    return %arg1, %arg0, %c0_i32 : i32, i32, i32
  }
}

</mosaic_0001>

<bundles_post_ra>
// kernel: tpu_custom_call.1
= control target key start
LH: loop header
LB: loop body
LE: loop exit
PB: predicated region body
PF: predicated region fallthrough
CT: control target
= control target key end

     0   :  { %8 = vsyncpa [#allocation3], 0  ;;  %s511_s0 = inlined_call_operand.hbm [shape: f32[8,512], index: 0, kind: input, shape index: {}]   ;;  %s512_s1 = inlined_call_operand.hbm [shape: f32[8,512], index: 1, kind: input, shape index: {}]   ;;  %s513_s2 = inlined_call_operand.hbm [shape: f32[2,8,512], index: 2, kind: input, shape index: {}]   ;;  %s514_s3 = inlined_call_operand.hbm [shape: f32[2,8,512], index: 3, kind: output, shape index: {}]  }
   0x1   :  { %9 = vsyncpa [#allocation6], 0 }
   0x2   :  { %10 = vsyncpa [#allocation4], 0  ;;  %s337_s12 = smov [#allocation5]   ;;  %s338_s14 = smov [#allocation2]  }
   0x3   :  { %s27_s13 = sshll.u32 %s337_s12, 4  ;;  %s17_s15 = sshll.u32 %s338_s14, 4  ;;  %s28_s13 = int_to_ptr.vmem [resolvable:$true] %s27_s13  ;;  %s18_s15 = int_to_ptr.vmem [resolvable:$true] %s17_s15 }
   0x4   :  { %s243_s18 = scalar_lea.hbm %s512_s1, 512 }
   0x5   :  { %p244_p0 = scmp.ne.s32.totalorder %s512_s1, %s243_s18  ;;  %p247_p1 = scmp.lt.u32.totalorder %s243_s18, %s512_s1 }
   0x7   :  { %p249_p2 = pnand %p247_p1, %p244_p0 }
   0x9   :  { %252 = shalt.err (!%p249_p2)
}
   0xa   :  { %s253_s23 = scalar_lea.vmem %s28_s13, 512  ;;  %p258_p4 = scmp.lt.s32.totalorder %s28_s13, %s28_s13 }
   0xb   :  { %p254_p3 = scmp.ne.s32.totalorder %s28_s13, %s253_s23  ;;  %p259_p5 = scmp.lt.s32.totalorder %s253_s23, %s253_s23 }
   0xd   :  { %p260_p6 = por %p259_p5, %p258_p4 }
   0xf   :  { %p261_p7 = pnand %p260_p6, %p254_p3 }
  0x11   :  { %264 = shalt.err (!%p261_p7)
}
  0x12   :  { %30 = dma.hbm_to_vmem [thread:$0]  %s512_s1, 512, %s28_s13, [#allocation6]  }
  0x13   :  { %s265_s28 = scalar_lea.hbm %s511_s0, 512 }
  0x14   :  { %p266_p8 = scmp.ne.s32.totalorder %s511_s0, %s265_s28  ;;  %p269_p9 = scmp.lt.u32.totalorder %s265_s28, %s511_s0 }
  0x16   :  { %p271_p10 = pnand %p269_p9, %p266_p8 }
  0x18   :  { %274 = shalt.err (!%p271_p10)
}
  0x19   :  { %s275_s6 = scalar_lea.vmem %s18_s15, 512  ;;  %p280_p12 = scmp.lt.s32.totalorder %s18_s15, %s18_s15 }
  0x1a   :  { %p276_p11 = scmp.ne.s32.totalorder %s18_s15, %s275_s6  ;;  %p281_p13 = scmp.lt.s32.totalorder %s275_s6, %s275_s6 }
  0x1c   :  { %p282_p0 = por %p281_p13, %p280_p12 }
  0x1e   :  { %p283_p1 = pnand %p282_p0, %p276_p11 }
  0x20   :  { %286 = shalt.err (!%p283_p1)
}
  0x21   :  { %20 = dma.hbm_to_vmem [thread:$0]  %s511_s0, 512, %s18_s15, [#allocation3]  }
  0x22   :  { %s339_s8 = smov [#allocation7]   ;;  %s287_s12 = scalar_lea.hbm %s513_s2, 1024 }
  0x23   :  { %s36_s9 = sshll.u32 %s339_s8, 4  ;;  %p288_p2 = scmp.ne.s32.totalorder %s513_s2, %s287_s12  ;;  %s37_s9 = int_to_ptr.vmem [resolvable:$true] %s36_s9 }
  0x24   :  { %p291_p3 = scmp.lt.u32.totalorder %s287_s12, %s513_s2 }
  0x26   :  { %p293_p4 = pnand %p291_p3, %p288_p2 }
  0x28   :  { %296 = shalt.err (!%p293_p4)
}
  0x29   :  { %s297_s18 = scalar_lea.vmem %s37_s9, 1024  ;;  %p302_p6 = scmp.lt.s32.totalorder %s37_s9, %s37_s9 }
  0x2a   :  { %p298_p5 = scmp.ne.s32.totalorder %s37_s9, %s297_s18  ;;  %p303_p7 = scmp.lt.s32.totalorder %s297_s18, %s297_s18 }
  0x2c   :  { %p304_p8 = por %p303_p7, %p302_p6 }
  0x2e   :  { %p305_p9 = pnand %p304_p8, %p298_p5 }
  0x30   :  { %308 = shalt.err (!%p305_p9)
}
  0x31   :  { %s340_s0 = smov 512   ;;  %s341_s15 = smov 32  }
  0x32   :  { %42 = dma.hbm_to_vmem [thread:$0]  %s513_s2, 1024, %s37_s9, [#allocation6], %s340_s0, %s340_s0, %s341_s15  }
  0x33   :  { %331 = dma.done.wait [#allocation3], 512  }
  0x34   :  { %332 = vsyncadd [#allocation3], 4294966784 }
  0x35   :  { %333 = dma.done.wait [#allocation6], 1536  }
  0x36   :  { %334 = vsyncadd [#allocation6], 4294965760  ;;  %v119_v0 = vld [vmem:[#allocation7 + $0x10] sm:$0xff]  ;;  %v117_v1 = vld [vmem:[#allocation7] sm:$0xff]  ;;  %s342_s21 = smov 112   ;;  %s343_s22 = smov 16   ;;  %v60_v8 = vlaneseq }
  0x37   :  { %125 = vrot.lane.b32.xlu1 %v119_v0, %s342_s21  ;;  %121 = vrot.lane.b32.xlu0 %v117_v1, %s342_s21  ;;  %v120_v2 = vld [vmem:[#allocation7 + $0x18] sm:$0xff]  ;;  %v118_v3 = vld [vmem:[#allocation7 + $0x8] sm:$0xff]  ;;  %v406_v5 = vld [vmem:[#allocation7 + $0x20] sm:$0xff]  ;;  %s344_s2 = smov [#allocation8]  }
  0x38   :  { %v404_v4 = vld [vmem:[#allocation7 + $0x28] sm:$0xff]  ;;  %v410_v6 = vld [vmem:[#allocation7 + $0x38] sm:$0xff]  ;;  %v412_v7 = vld [vmem:[#allocation7 + $0x30] sm:$0xff]  ;;  %v420_v9 = vand.u32 127, %v60_v8  ;;  %s222_s23 = sshll.u32 %s344_s2, 4  ;;  %s223_s23 = int_to_ptr.vmem [resolvable:$true] %s222_s23 }
  0x39   :  { %v53_v18 = vld [vmem:[#allocation2 + $0x8] sm:$0xff]  ;;  %v54_v20 = vld [vmem:[#allocation2 + $0x10] sm:$0xff]  ;;  %v52_v24 = vld [vmem:[#allocation2] sm:$0xff]  ;;  %s309_s24 = scalar_lea.vmem %s223_s23, 1024  ;;  %p314_p11 = scmp.lt.s32.totalorder %s223_s23, %s223_s23 }
  0x3a   :  { %v62_v10 = vadd.s32 128, %v420_v9  ;;  %v63_v14 = vadd.s32 256, %v420_v9  ;;  %v64_v15 = vadd.s32 384, %v420_v9  ;;  %vm129_vm0 = vcmp.lt.s32.totalorder %v420_v9, 112  ;;  %v57_v27 = vld [vmem:[#allocation5 + $0x8] sm:$0xff]  ;;  %v55_v28 = vld [vmem:[#allocation2 + $0x18] sm:$0xff]  ;;  %p310_p10 = scmp.ne.s32.totalorder %s223_s23, %s309_s24  ;;  %p315_p12 = scmp.lt.s32.totalorder %s309_s24, %s309_s24 }
  0x3b   :  { %127 = vrot.lane.b32.xlu1 %v120_v2, %s342_s21  ;;  %123 = vrot.lane.b32.xlu0 %v118_v3, %s342_s21  ;;  %vm142_vm1 = vcmp.lt.s32.totalorder %v420_v9, 16  ;;  %v69_v19 = vand.u32 31, %v420_v9  ;;  %v152_v29 = vmul.f32 %v118_v3, %v53_v18  ;;  %v153_v32 = vmul.f32 %v119_v0, %v54_v20  ;;  %v56_v44 = vld [vmem:[#allocation5] sm:$0xff]  ;;  %v58_v46 = vld [vmem:[#allocation5 + $0x10] sm:$0xff]  ;;  %v59_v47 = vld [vmem:[#allocation5 + $0x18] sm:$0xff] }
  0x3c   :  { %v76_v13 = vand.u32 31, %v62_v10  ;;  %v83_v22 = vand.u32 31, %v63_v14  ;;  %v90_v23 = vand.u32 31, %v64_v15  ;;  %v151_v35 = vmul.f32 %v117_v1, %v52_v24  ;;  %p316_p13 = por %p315_p12, %p314_p11 }
  0x3d   :  { %vm438_vm3 = vcmp.lt.s32.totalorder %v69_v19, 16  ;;  %v154_v39 = vmul.f32 %v120_v2, %v55_v28  ;;  %v202_v15 = vmul.f32 %v412_v7, %v54_v20 }
  0x3e   :  { %vm428_vm2 = vcmp.lt.s32.totalorder %v76_v13, 16  ;;  %vm442_vm4 = vcmp.lt.s32.totalorder %v83_v22, 16  ;;  %vm446_vm5 = vcmp.lt.s32.totalorder %v90_v23, 16  ;;  %v203_v13 = vmul.f32 %v410_v6, %v55_v28  ;;  %p317_p0 = pnand %p316_p13, %p310_p10 }
  0x3f   :  { %136 = vrot.lane.b32.xlu1 %v118_v3, %s343_s22  ;;  %134 = vrot.lane.b32.xlu0 %v117_v1, %s343_s22  ;;  %v201_v3 = vmul.f32 %v404_v4, %v53_v18 }
  0x43   :  { %140 = vrot.lane.b32.xlu1 %v120_v2, %s343_s22  ;;  %138 = vrot.lane.b32.xlu0 %v119_v0, %s343_s22 }
  0x47   :  { %174 = vrot.lane.b32.xlu1 %v404_v4, %s342_s21  ;;  %172 = vrot.lane.b32.xlu0 %v406_v5, %s342_s21 }
  0x4b   :  { %178 = vrot.lane.b32.xlu1 %v410_v6, %s342_s21  ;;  %176 = vrot.lane.b32.xlu0 %v412_v7, %s342_s21 }
  0x4f   :  { %186 = vrot.lane.b32.xlu1 %v404_v4, %s343_s22  ;;  %184 = vrot.lane.b32.xlu0 %v406_v5, %s343_s22 }
  0x53   :  { %190 = vrot.lane.b32.xlu1 %v410_v6, %s343_s22  ;;  %188 = vrot.lane.b32.xlu0 %v412_v7, %s343_s22 }
  0xa9   :  { %v126_v11 = vpop.permute.xlu1 %125  ;;  %v122_v12 = vpop.permute.xlu0 %121 }
  0xad   :  { %v128_v16 = vpop.permute.xlu1 %127  ;;  %v124_v17 = vpop.permute.xlu0 %123 }
  0xae   :  { %v131_v30 = vsel %vm129_vm0, %v124_v17, %v126_v11  ;;  %v130_v40 = vsel %vm129_vm0, %v126_v11, %v128_v16  ;;  %v133_v41 = vsel %vm129_vm0, %v128_v16, %v122_v12  ;;  %v132_v42 = vsel %vm129_vm0, %v122_v12, %v124_v17 }
  0xaf   :  { %v200_v12 = vmul.f32 %v406_v5, %v52_v24 }
  0xb1   :  { %v137_v25 = vpop.permute.xlu1 %136  ;;  %v135_v26 = vpop.permute.xlu0 %134 }
  0xb2   :  { %v145_v31 = vsel %vm142_vm1, %v135_v26, %v137_v25 }
  0xb3   :  { %v148_v33 = vsel %vm428_vm2, %v131_v30, %v145_v31 }
  0xb4   :  { %v156_v36 = vmul.f32 %v148_v33, %v57_v27 }
  0xb5   :  { %v141_v43 = vpop.permute.xlu1 %140  ;;  %v139_v45 = vpop.permute.xlu0 %138 }
  0xb6   :  { %v160_v48 = vadd.f32 %v156_v36, %v152_v29  ;;  %v146_v49 = vsel %vm142_vm1, %v141_v43, %v135_v26  ;;  %v143_v50 = vsel %vm142_vm1, %v139_v45, %v141_v43  ;;  %v144_v51 = vsel %vm142_vm1, %v137_v25, %v139_v45 }
  0xb7   :  { %v147_v52 = vsel %vm438_vm3, %v132_v42, %v146_v49  ;;  %v149_v53 = vsel %vm442_vm4, %v130_v40, %v144_v51  ;;  %v150_v54 = vsel %vm446_vm5, %v133_v41, %v143_v50 }
  0xb8   :  { %164 = vst [vmem:[#allocation8 + $0x8] sm:$0xff] %v160_v48  ;;  %v155_v55 = vmul.f32 %v147_v52, %v56_v44  ;;  %v157_v56 = vmul.f32 %v149_v53, %v58_v46  ;;  %v158_v57 = vmul.f32 %v150_v54, %v59_v47 }
  0xb9   :  { %v175_v58 = vpop.permute.xlu1 %174  ;;  %v173_v59 = vpop.permute.xlu0 %172 }
  0xba   :  { %v159_v60 = vadd.f32 %v155_v55, %v151_v35  ;;  %v161_v61 = vadd.f32 %v157_v56, %v153_v32  ;;  %v162_v62 = vadd.f32 %v158_v57, %v154_v39  ;;  %v182_v16 = vsel %vm129_vm0, %v173_v59, %v175_v58 }
  0xbc   :  { %163 = vst [vmem:[#allocation8] sm:$0xff] %v159_v60  ;;  %165 = vst [vmem:[#allocation8 + $0x10] sm:$0xff] %v161_v61 }
  0xbd   :  { %166 = vst [vmem:[#allocation8 + $0x18] sm:$0xff] %v162_v62  ;;  %v179_v63 = vpop.permute.xlu1 %178  ;;  %v177_v0 = vpop.permute.xlu0 %176 }
  0xbe   :  { %v181_v8 = vsel %vm129_vm0, %v175_v58, %v177_v0  ;;  %v183_v4 = vsel %vm129_vm0, %v179_v63, %v173_v59  ;;  %v180_v17 = vsel %vm129_vm0, %v177_v0, %v179_v63 }
  0xc1   :  { %v187_v1 = vpop.permute.xlu1 %186  ;;  %v185_v2 = vpop.permute.xlu0 %184 }
  0xc2   :  { %v194_v10 = vsel %vm142_vm1, %v185_v2, %v187_v1 }
  0xc3   :  { %v197_v11 = vsel %vm428_vm2, %v181_v8, %v194_v10 }
  0xc4   :  { %v205_v14 = vmul.f32 %v197_v11, %v57_v27 }
  0xc5   :  { %v191_v18 = vpop.permute.xlu1 %190  ;;  %v189_v19 = vpop.permute.xlu0 %188 }
  0xc6   :  { %v209_v21 = vadd.f32 %v205_v14, %v201_v3  ;;  %v195_v5 = vsel %vm142_vm1, %v191_v18, %v185_v2  ;;  %v192_v6 = vsel %vm142_vm1, %v189_v19, %v191_v18  ;;  %v193_v7 = vsel %vm142_vm1, %v187_v1, %v189_v19 }
  0xc7   :  { %v196_v20 = vsel %vm438_vm3, %v182_v16, %v195_v5  ;;  %v198_v22 = vsel %vm442_vm4, %v180_v17, %v193_v7  ;;  %v199_v23 = vsel %vm446_vm5, %v183_v4, %v192_v6 }
  0xc8   :  { %214 = vst [vmem:[#allocation8 + $0x28] sm:$0xff] %v209_v21  ;;  %v204_v24 = vmul.f32 %v196_v20, %v56_v44  ;;  %v206_v25 = vmul.f32 %v198_v22, %v58_v46  ;;  %v207_v26 = vmul.f32 %v199_v23, %v59_v47 }
  0xca   :  { %v208_v27 = vadd.f32 %v204_v24, %v200_v12  ;;  %v210_v28 = vadd.f32 %v206_v25, %v202_v15  ;;  %v211_v29 = vadd.f32 %v207_v26, %v203_v13 }
  0xcc   :  { %213 = vst [vmem:[#allocation8 + $0x20] sm:$0xff] %v208_v27  ;;  %215 = vst [vmem:[#allocation8 + $0x30] sm:$0xff] %v210_v28 }
  0xcd   :  { %216 = vst [vmem:[#allocation8 + $0x38] sm:$0xff] %v211_v29 }
  0xce   :  { %320 = shalt.err (!%p317_p0)
}
  0xcf   :  { %s321_s27 = scalar_lea.hbm %s514_s3, 1024 }
  0xd0   :  { %p322_p1 = scmp.ne.s32.totalorder %s514_s3, %s321_s27  ;;  %p325_p2 = scmp.lt.u32.totalorder %s321_s27, %s514_s3 }
  0xd2   :  { %p327_p3 = pnand %p325_p2, %p322_p1 }
  0xd4   :  { %330 = shalt.err (!%p327_p3)
}
  0xd5   :  { %228 = dma.vmem_to_hbm [thread:$0]  %s223_s23, 1024, %s514_s3, [#allocation4], %s340_s0, %s340_s0, %s341_s15  }
  0xd6   :  { %335 = dma.done.wait [#allocation4], 1024  }
  0xd7   :  { %336 = vsyncadd [#allocation4], 4294966272 }
  0xd8   :  { %232 = vsyncpa [#allocation3], 1 }
  0xd9   :  { %233 = vsyncpa [#allocation6], 1 }
  0xda   :  { %234 = vsyncpa [#allocation4], 1 }

</bundles_post_ra>
